<compile_context>
chip_gen: v7x
topology: tpu7x:2x2x1
jax: 0.10.0
libtpu: 0.0.40
codegen_flags: <defaults>
</compile_context>

<pallas_src>
import functools

import jax
import jax.numpy as jnp
from jax.experimental import pallas as pl
from jax.experimental.pallas import tpu as pltpu

HIDDEN = 120       # PyTorch hidden width
HIDDEN_PAD = 128   # lane-dense hidden width
OUT_PAD = 128      # lane-dense output width
TB_MAX = 512       # max batch-tile rows (weights ~100 KB, tiles << VMEM on v5e/v6e/v7x)


def _softplus(x):
    # PyTorch F.softplus(beta=1, threshold=20): identity for x > 20.
    safe = jnp.minimum(x, 20.0)
    return jnp.where(x > 20.0, x, jnp.log1p(jnp.exp(safe)))


def mlp_kernel(x_ref, w1_ref, b1_ref, w2_ref, b2_ref,
               w3_ref, b3_ref, w4_ref, b4_ref, o_ref):
    # bf16 MXU operands, f32 accumulation; bias add + softplus in f32 (v5e VPU/EUP).
    x = x_ref[...].astype(jnp.bfloat16)
    h = jnp.dot(x, w1_ref[...], preferred_element_type=jnp.float32) + b1_ref[...]
    h = _softplus(h)
    h = jnp.dot(h.astype(jnp.bfloat16), w2_ref[...],
                preferred_element_type=jnp.float32) + b2_ref[...]
    h = _softplus(h)
    h = jnp.dot(h.astype(jnp.bfloat16), w3_ref[...],
                preferred_element_type=jnp.float32) + b3_ref[...]
    h = _softplus(h)
    out = jnp.dot(h.astype(jnp.bfloat16), w4_ref[...],
                  preferred_element_type=jnp.float32) + b4_ref[...]
    o_ref[...] = out.astype(o_ref.dtype)


def _round_up(x, m):
    return ((x + m - 1) // m) * m


@functools.partial(jax.jit, static_argnames=("n_classes",))
def net_forward(x, padded_params, n_classes):
    (w1, b1), (w2, b2), (w3, b3), (w4, b4) = padded_params
    B, F = x.shape

    tb = min(TB_MAX, _round_up(B, 8))        # batch tile (sublane-aligned)
    b_pad = _round_up(B, tb)
    if b_pad != B:
        x = jnp.pad(x, ((0, b_pad - B), (0, 0)))

    def resident(shape):
        # Same block index every grid step -> DMA'd once, stays resident in VMEM.
        return pl.BlockSpec(shape, lambda i: (0, 0))

    out_padded = pl.pallas_call(
        mlp_kernel,
        out_shape=jax.ShapeDtypeStruct((b_pad, OUT_PAD), jnp.float32),
        grid=(b_pad // tb,),
        in_specs=[
            pl.BlockSpec((tb, F), lambda i: (i, 0)),   # x: tiled over batch
            resident(w1.shape), resident(b1.shape),
            resident(w2.shape), resident(b2.shape),
            resident(w3.shape), resident(b3.shape),
            resident(w4.shape), resident(b4.shape),
        ],
        out_specs=pl.BlockSpec((tb, OUT_PAD), lambda i: (i, 0)),
        compiler_params=pltpu.CompilerParams(
            dimension_semantics=("parallel",)),
    )(x, w1, b1, w2, b2, w3, b3, w4, b4)

    return out_padded[:B, :n_classes]


def init_params(key, n_features, n_classes):
    """Mimic nn.Linear.reset_parameters: U(-1/sqrt(fan_in), 1/sqrt(fan_in)).
    Weights stored as (in, out) so the kernel computes y = x @ W + b."""
    dims = [(n_features, HIDDEN), (HIDDEN, HIDDEN), (HIDDEN, HIDDEN), (HIDDEN, n_classes)]
    params = []
    for fan_in, fan_out in dims:
        key, kw, kb = jax.random.split(key, 3)
        bound = 1.0 / jnp.sqrt(jnp.float32(fan_in))
        w = jax.random.uniform(kw, (fan_in, fan_out), jnp.float32, -bound, bound)
        b = jax.random.uniform(kb, (fan_out,), jnp.float32, -bound, bound)
        params.append((w, b))
    return tuple(params)


def prepare_params(raw_params, n_features):
    """Zero-pad hidden/output widths to 128 (lane-dense) and cast weights to bf16."""
    (w1, b1), (w2, b2), (w3, b3), (w4, b4) = raw_params

    def pad_w(a, rows, cols):
        return jnp.pad(a, ((0, rows - a.shape[0]), (0, cols - a.shape[1])))

    def pad_b(b, cols):
        b2d = b.reshape(1, -1)
        return jnp.pad(b2d, ((0, 0), (0, cols - b2d.shape[1])))

    w1p = pad_w(w1, n_features, HIDDEN_PAD).astype(jnp.bfloat16)
    w2p = pad_w(w2, HIDDEN_PAD, HIDDEN_PAD).astype(jnp.bfloat16)
    w3p = pad_w(w3, HIDDEN_PAD, HIDDEN_PAD).astype(jnp.bfloat16)
    w4p = pad_w(w4, HIDDEN_PAD, OUT_PAD).astype(jnp.bfloat16)
    return ((w1p, pad_b(b1, HIDDEN_PAD)),
            (w2p, pad_b(b2, HIDDEN_PAD)),
            (w3p, pad_b(b3, HIDDEN_PAD)),
            (w4p, pad_b(b4, OUT_PAD)))


def reference_forward_f32(x, raw_params):
    # Pure f32 reference == PyTorch module semantics.
    h = x
    for i, (w, b) in enumerate(raw_params):
        h = h @ w + b
        if i < 3:
            h = jnp.where(h > 20.0, h, jnp.log1p(jnp.exp(jnp.minimum(h, 20.0))))
    return h


def reference_forward_bf16(x, raw_params):
    # Same numerics as the kernel: bf16 matmul operands, f32 accumulation/activations.
    h = x
    for i, (w, b) in enumerate(raw_params):
        h = jnp.dot(h.astype(jnp.bfloat16), w.astype(jnp.bfloat16),
                    preferred_element_type=jnp.float32) + b
        if i < 3:
            h = jnp.where(h > 20.0, h, jnp.log1p(jnp.exp(jnp.minimum(h, 20.0))))
    return h


if __name__ == "__main__":
    key = jax.random.PRNGKey(0)
    n_features, n_classes, batch = 32, 10, 8

    key, kx = jax.random.split(key)
    x = jax.random.normal(kx, (batch, n_features), jnp.float32)
    raw_params = init_params(key, n_features, n_classes)
    params = prepare_params(raw_params, n_features)

    out = net_forward(x, params, n_classes)
    out = jax.block_until_ready(out)
    assert out.shape == (batch, n_classes)

    # Check against a reference with identical (bf16-operand) matmul precision.
    ref_bf16 = reference_forward_bf16(x, raw_params)
    assert jnp.allclose(out, ref_bf16, atol=1e-2, rtol=1e-2), "mismatch vs bf16 reference"

    # Sanity-check against the full-f32 PyTorch-semantics reference (looser tol).
    ref_f32 = reference_forward_f32(x, raw_params)
    assert jnp.allclose(out, ref_f32, atol=5e-2, rtol=5e-2), "mismatch vs f32 reference"

    print("KERNEL_OK")
</pallas_src>

<mosaic_0001>
module attributes {stable_mosaic.version = 11 : i64} {
  func.func @mlp_kernel(%arg0: i32, %arg1: memref<8x32xf32, #tpu.memory_space<vmem>>, %arg2: memref<32x128xbf16, #tpu.memory_space<vmem>>, %arg3: memref<1x128xf32, #tpu.memory_space<vmem>>, %arg4: memref<128x128xbf16, #tpu.memory_space<vmem>>, %arg5: memref<1x128xf32, #tpu.memory_space<vmem>>, %arg6: memref<128x128xbf16, #tpu.memory_space<vmem>>, %arg7: memref<1x128xf32, #tpu.memory_space<vmem>>, %arg8: memref<128x128xbf16, #tpu.memory_space<vmem>>, %arg9: memref<1x128xf32, #tpu.memory_space<vmem>>, %arg10: memref<8x128xf32, #tpu.memory_space<vmem>>) attributes {dimension_semantics = [#tpu.dimension_semantics<parallel>], iteration_bounds = array<i64: 1>, scalar_prefetch = 0 : i64, scratch_operands = 0 : i64, tpu.core_type = #tpu.core_type<tc>, window_params = [{transform_indices = @transform_0, window_bounds = array<i64: 8, 32>}, {pipeline_mode = #tpu.pipeline_mode<synchronous>, transform_indices = @transform_1, window_bounds = array<i64: 32, 128>}, {pipeline_mode = #tpu.pipeline_mode<synchronous>, transform_indices = @transform_2, window_bounds = array<i64: 1, 128>}, {pipeline_mode = #tpu.pipeline_mode<synchronous>, transform_indices = @transform_3, window_bounds = array<i64: 128, 128>}, {pipeline_mode = #tpu.pipeline_mode<synchronous>, transform_indices = @transform_4, window_bounds = array<i64: 1, 128>}, {pipeline_mode = #tpu.pipeline_mode<synchronous>, transform_indices = @transform_5, window_bounds = array<i64: 128, 128>}, {pipeline_mode = #tpu.pipeline_mode<synchronous>, transform_indices = @transform_6, window_bounds = array<i64: 1, 128>}, {pipeline_mode = #tpu.pipeline_mode<synchronous>, transform_indices = @transform_7, window_bounds = array<i64: 128, 128>}, {pipeline_mode = #tpu.pipeline_mode<synchronous>, transform_indices = @transform_8, window_bounds = array<i64: 1, 128>}, {transform_indices = @transform_9, window_bounds = array<i64: 8, 128>}]} {
    %c0 = arith.constant 0 : index
    %c0_0 = arith.constant 0 : index
    %0 = vector.load %arg1[%c0, %c0_0] : memref<8x32xf32, #tpu.memory_space<vmem>>, vector<8x32xf32>
    %1 = arith.truncf %0 : vector<8x32xf32> to vector<8x32xbf16>
    %c0_1 = arith.constant 0 : index
    %c0_2 = arith.constant 0 : index
    %2 = vector.load %arg2[%c0_1, %c0_2] : memref<32x128xbf16, #tpu.memory_space<vmem>>, vector<32x128xbf16>
    %cst = arith.constant dense<0.000000e+00> : vector<8x128xf32>
    %3 = tpu.matmul %1, %2, %cst {dimension_numbers = #tpu.dot_dimension_numbers<[1], [0], [0], [1], [0, 0, 1, 1], [], []>} : vector<8x32xbf16>, vector<32x128xbf16>, vector<8x128xf32> -> vector<8x128xf32>
    %c0_3 = arith.constant 0 : index
    %c0_4 = arith.constant 0 : index
    %4 = vector.load %arg3[%c0_3, %c0_4] : memref<1x128xf32, #tpu.memory_space<vmem>>, vector<1x128xf32>
    %5 = vector.broadcast %4 : vector<1x128xf32> to vector<8x128xf32>
    %6 = arith.addf %3, %5 : vector<8x128xf32>
    %cst_5 = arith.constant 2.000000e+01 : f32
    %7 = vector.broadcast %cst_5 : f32 to vector<8x128xf32>
    %8 = arith.minimumf %6, %7 : vector<8x128xf32>
    %cst_6 = arith.constant 2.000000e+01 : f32
    %9 = vector.broadcast %cst_6 : f32 to vector<8x128xf32>
    %10 = arith.cmpf ogt, %6, %9 : vector<8x128xf32>
    %11 = math.exp %8 : vector<8x128xf32>
    %12 = math.log1p %11 : vector<8x128xf32>
    %13 = arith.select %10, %6, %12 : vector<8x128xi1>, vector<8x128xf32>
    %14 = arith.truncf %13 : vector<8x128xf32> to vector<8x128xbf16>
    %c0_7 = arith.constant 0 : index
    %c0_8 = arith.constant 0 : index
    %15 = vector.load %arg4[%c0_7, %c0_8] : memref<128x128xbf16, #tpu.memory_space<vmem>>, vector<128x128xbf16>
    %cst_9 = arith.constant dense<0.000000e+00> : vector<8x128xf32>
    %16 = tpu.matmul %14, %15, %cst_9 {dimension_numbers = #tpu.dot_dimension_numbers<[1], [0], [0], [1], [0, 0, 1, 1], [], []>} : vector<8x128xbf16>, vector<128x128xbf16>, vector<8x128xf32> -> vector<8x128xf32>
    %c0_10 = arith.constant 0 : index
    %c0_11 = arith.constant 0 : index
    %17 = vector.load %arg5[%c0_10, %c0_11] : memref<1x128xf32, #tpu.memory_space<vmem>>, vector<1x128xf32>
    %18 = vector.broadcast %17 : vector<1x128xf32> to vector<8x128xf32>
    %19 = arith.addf %16, %18 : vector<8x128xf32>
    %cst_12 = arith.constant 2.000000e+01 : f32
    %20 = vector.broadcast %cst_12 : f32 to vector<8x128xf32>
    %21 = arith.minimumf %19, %20 : vector<8x128xf32>
    %cst_13 = arith.constant 2.000000e+01 : f32
    %22 = vector.broadcast %cst_13 : f32 to vector<8x128xf32>
    %23 = arith.cmpf ogt, %19, %22 : vector<8x128xf32>
    %24 = math.exp %21 : vector<8x128xf32>
    %25 = math.log1p %24 : vector<8x128xf32>
    %26 = arith.select %23, %19, %25 : vector<8x128xi1>, vector<8x128xf32>
    %27 = arith.truncf %26 : vector<8x128xf32> to vector<8x128xbf16>
    %c0_14 = arith.constant 0 : index
    %c0_15 = arith.constant 0 : index
    %28 = vector.load %arg6[%c0_14, %c0_15] : memref<128x128xbf16, #tpu.memory_space<vmem>>, vector<128x128xbf16>
    %cst_16 = arith.constant dense<0.000000e+00> : vector<8x128xf32>
    %29 = tpu.matmul %27, %28, %cst_16 {dimension_numbers = #tpu.dot_dimension_numbers<[1], [0], [0], [1], [0, 0, 1, 1], [], []>} : vector<8x128xbf16>, vector<128x128xbf16>, vector<8x128xf32> -> vector<8x128xf32>
    %c0_17 = arith.constant 0 : index
    %c0_18 = arith.constant 0 : index
    %30 = vector.load %arg7[%c0_17, %c0_18] : memref<1x128xf32, #tpu.memory_space<vmem>>, vector<1x128xf32>
    %31 = vector.broadcast %30 : vector<1x128xf32> to vector<8x128xf32>
    %32 = arith.addf %29, %31 : vector<8x128xf32>
    %cst_19 = arith.constant 2.000000e+01 : f32
    %33 = vector.broadcast %cst_19 : f32 to vector<8x128xf32>
    %34 = arith.minimumf %32, %33 : vector<8x128xf32>
    %cst_20 = arith.constant 2.000000e+01 : f32
    %35 = vector.broadcast %cst_20 : f32 to vector<8x128xf32>
    %36 = arith.cmpf ogt, %32, %35 : vector<8x128xf32>
    %37 = math.exp %34 : vector<8x128xf32>
    %38 = math.log1p %37 : vector<8x128xf32>
    %39 = arith.select %36, %32, %38 : vector<8x128xi1>, vector<8x128xf32>
    %40 = arith.truncf %39 : vector<8x128xf32> to vector<8x128xbf16>
    %c0_21 = arith.constant 0 : index
    %c0_22 = arith.constant 0 : index
    %41 = vector.load %arg8[%c0_21, %c0_22] : memref<128x128xbf16, #tpu.memory_space<vmem>>, vector<128x128xbf16>
    %cst_23 = arith.constant dense<0.000000e+00> : vector<8x128xf32>
    %42 = tpu.matmul %40, %41, %cst_23 {dimension_numbers = #tpu.dot_dimension_numbers<[1], [0], [0], [1], [0, 0, 1, 1], [], []>} : vector<8x128xbf16>, vector<128x128xbf16>, vector<8x128xf32> -> vector<8x128xf32>
    %c0_24 = arith.constant 0 : index
    %c0_25 = arith.constant 0 : index
    %43 = vector.load %arg9[%c0_24, %c0_25] : memref<1x128xf32, #tpu.memory_space<vmem>>, vector<1x128xf32>
    %44 = vector.broadcast %43 : vector<1x128xf32> to vector<8x128xf32>
    %45 = arith.addf %42, %44 : vector<8x128xf32>
    %c0_26 = arith.constant 0 : index
    %c0_27 = arith.constant 0 : index
    %46 = vector.load %arg10[%c0_26, %c0_27] : memref<8x128xf32, #tpu.memory_space<vmem>>, vector<8x128xf32>
    tpu.vector_store %arg10[%c0_26, %c0_27], %45 {strides = array<i32>} : memref<8x128xf32, #tpu.memory_space<vmem>>, vector<8x128xf32>,
    return
  }
  func.func @transform_0(%arg0: i32) -> (i32, i32) {
    %c0_i32 = arith.constant 0 : i32
    %c0_i32_0 = arith.constant 0 : i32
    return %arg0, %c0_i32 : i32, i32
  }
  func.func @transform_1(%arg0: i32) -> (i32, i32) {
    %c0_i32 = arith.constant 0 : i32
    %c0_i32_0 = arith.constant 0 : i32
    %c0_i32_1 = arith.constant 0 : i32
    return %c0_i32, %c0_i32_0 : i32, i32
  }
  func.func @transform_2(%arg0: i32) -> (i32, i32) {
    %c0_i32 = arith.constant 0 : i32
    %c0_i32_0 = arith.constant 0 : i32
    %c0_i32_1 = arith.constant 0 : i32
    return %c0_i32, %c0_i32_0 : i32, i32
  }
  func.func @transform_3(%arg0: i32) -> (i32, i32) {
    %c0_i32 = arith.constant 0 : i32
    %c0_i32_0 = arith.constant 0 : i32
    %c0_i32_1 = arith.constant 0 : i32
    return %c0_i32, %c0_i32_0 : i32, i32
  }
  func.func @transform_4(%arg0: i32) -> (i32, i32) {
    %c0_i32 = arith.constant 0 : i32
    %c0_i32_0 = arith.constant 0 : i32
    %c0_i32_1 = arith.constant 0 : i32
    return %c0_i32, %c0_i32_0 : i32, i32
  }
  func.func @transform_5(%arg0: i32) -> (i32, i32) {
    %c0_i32 = arith.constant 0 : i32
    %c0_i32_0 = arith.constant 0 : i32
    %c0_i32_1 = arith.constant 0 : i32
    return %c0_i32, %c0_i32_0 : i32, i32
  }
  func.func @transform_6(%arg0: i32) -> (i32, i32) {
    %c0_i32 = arith.constant 0 : i32
    %c0_i32_0 = arith.constant 0 : i32
    %c0_i32_1 = arith.constant 0 : i32
    return %c0_i32, %c0_i32_0 : i32, i32
  }
  func.func @transform_7(%arg0: i32) -> (i32, i32) {
    %c0_i32 = arith.constant 0 : i32
    %c0_i32_0 = arith.constant 0 : i32
    %c0_i32_1 = arith.constant 0 : i32
    return %c0_i32, %c0_i32_0 : i32, i32
  }
  func.func @transform_8(%arg0: i32) -> (i32, i32) {
    %c0_i32 = arith.constant 0 : i32
    %c0_i32_0 = arith.constant 0 : i32
    %c0_i32_1 = arith.constant 0 : i32
    return %c0_i32, %c0_i32_0 : i32, i32
  }
  func.func @transform_9(%arg0: i32) -> (i32, i32) {
    %c0_i32 = arith.constant 0 : i32
    %c0_i32_0 = arith.constant 0 : i32
    return %arg0, %c0_i32 : i32, i32
  }
}

</mosaic_0001>

<bundles_post_ra>
// kernel: net_forward.1
= control target key start
LH: loop header
LB: loop body
LE: loop exit
PB: predicated region body
PF: predicated region fallthrough
CT: control target
= control target key end

     0   :  { %14 = vsyncpa [#allocation3], 0  ;;  %s1072_s0 = inlined_call_operand.hbm [shape: f32[8,32], index: 0, kind: input, shape index: {}]   ;;  %s1073_s1 = inlined_call_operand.hbm [shape: bf16[32,128], index: 1, kind: input, shape index: {}]   ;;  %s1074_s2 = inlined_call_operand.vmem [shape: f32[1,128], index: 2, kind: input, shape index: {}]   ;;  %s1075_s3 = inlined_call_operand.hbm [shape: bf16[128,128], index: 3, kind: input, shape index: {}]   ;;  %s1076_s4 = inlined_call_operand.vmem [shape: f32[1,128], index: 4, kind: input, shape index: {}]   ;;  %s1077_s5 = inlined_call_operand.hbm [shape: bf16[128,128], index: 5, kind: input, shape index: {}]   ;;  %s1078_s6 = inlined_call_operand.vmem [shape: f32[1,128], index: 6, kind: input, shape index: {}]   ;;  %s1079_s7 = inlined_call_operand.hbm [shape: bf16[128,128], index: 7, kind: input, shape index: {}]   ;;  %s1080_s8 = inlined_call_operand.vmem [shape: f32[1,128], index: 8, kind: input, shape index: {}]   ;;  %s1081_s9 = inlined_call_operand.hbm [shape: f32[8,128], index: 9, kind: output, shape index: {}]  }
   0x1   :  { %15 = vsyncpa [#allocation6], 0 }
   0x2   :  { %16 = vsyncpa [#allocation9], 0 }
   0x3   :  { %17 = vsyncpa [#allocation4], 0  ;;  %s882_s30 = smov [#allocation5]   ;;  %s742_s13 = scalar_lea.hbm %s1073_s1, 256 }
   0x4   :  { %s33_s10 = sshll.u32 %s882_s30, 4  ;;  %p743_p0 = scmp.ne.s32.totalorder %s1073_s1, %s742_s13  ;;  %s34_s10 = int_to_ptr.vmem [resolvable:$true] %s33_s10 }
   0x5   :  { %p746_p1 = scmp.lt.u32.totalorder %s742_s13, %s1073_s1 }
   0x7   :  { %p748_p2 = pnand %p746_p1, %p743_p0 }
   0x9   :  { %751 = shalt.err (!%p748_p2)
}
   0xa   :  { %s752_s18 = scalar_lea.vmem %s34_s10, 256  ;;  %p757_p4 = scmp.lt.s32.totalorder %s34_s10, %s34_s10 }
   0xb   :  { %p753_p3 = scmp.ne.s32.totalorder %s34_s10, %s752_s18  ;;  %p758_p5 = scmp.lt.s32.totalorder %s752_s18, %s752_s18 }
   0xd   :  { %p759_p6 = por %p758_p5, %p757_p4 }
   0xf   :  { %p760_p7 = pnand %p759_p6, %p753_p3 }
  0x11   :  { %763 = shalt.err (!%p760_p7)
}
  0x12   :  { %s883_s19 = smov 64   ;;  %s884_s20 = smov 4  }
  0x13   :  { %39 = dma.hbm_to_vmem [thread:$0]  %s1073_s1, 256, %s34_s10, [#allocation6], %s883_s19, %s883_s19, %s884_s20  }
  0x14   :  { %s885_s23 = smov [#allocation8]   ;;  %s886_s25 = smov [#allocation2]  }
  0x15   :  { %s61_s24 = sshll.u32 %s885_s23, 4  ;;  %s24_s26 = sshll.u32 %s886_s25, 4  ;;  %s62_s24 = int_to_ptr.vmem [resolvable:$true] %s61_s24  ;;  %s25_s26 = int_to_ptr.vmem [resolvable:$true] %s24_s26 }
  0x16   :  { %s764_s29 = scalar_lea.hbm %s1077_s5, 1024 }
  0x17   :  { %p765_p8 = scmp.ne.s32.totalorder %s1077_s5, %s764_s29  ;;  %p768_p9 = scmp.lt.u32.totalorder %s764_s29, %s1077_s5 }
  0x19   :  { %p770_p10 = pnand %p768_p9, %p765_p8 }
  0x1b   :  { %773 = shalt.err (!%p770_p10)
}
  0x1c   :  { %s774_s1 = scalar_lea.vmem %s62_s24, 1024  ;;  %p779_p12 = scmp.lt.s32.totalorder %s62_s24, %s62_s24 }
  0x1d   :  { %p775_p11 = scmp.ne.s32.totalorder %s62_s24, %s774_s1  ;;  %p780_p13 = scmp.lt.s32.totalorder %s774_s1, %s774_s1 }
  0x1f   :  { %p781_p0 = por %p780_p13, %p779_p12 }
  0x21   :  { %p782_p1 = pnand %p781_p0, %p775_p11 }
  0x23   :  { %785 = shalt.err (!%p782_p1)
}
  0x24   :  { %67 = dma.hbm_to_vmem [thread:$0]  %s1077_s5, 1024, %s62_s24, [#allocation9], %s883_s19, %s883_s19, %s884_s20  }
  0x25   :  { %s786_s17 = scalar_lea.hbm %s1072_s0, 128 }
  0x26   :  { %p787_p2 = scmp.ne.s32.totalorder %s1072_s0, %s786_s17  ;;  %p790_p3 = scmp.lt.u32.totalorder %s786_s17, %s1072_s0 }
  0x28   :  { %p792_p4 = pnand %p790_p3, %p787_p2 }
  0x2a   :  { %795 = shalt.err (!%p792_p4)
}
  0x2b   :  { %s796_s25 = scalar_lea.vmem %s25_s26, 128  ;;  %p801_p6 = scmp.lt.s32.totalorder %s25_s26, %s25_s26 }
  0x2c   :  { %p797_p5 = scmp.ne.s32.totalorder %s25_s26, %s796_s25  ;;  %p802_p7 = scmp.lt.s32.totalorder %s796_s25, %s796_s25 }
  0x2e   :  { %p803_p8 = por %p802_p7, %p801_p6 }
  0x30   :  { %p804_p9 = pnand %p803_p8, %p797_p5 }
  0x32   :  { %807 = shalt.err (!%p804_p9)
}
  0x33   :  { %27 = dma.hbm_to_vmem [thread:$0]  %s1072_s0, 128, %s25_s26, [#allocation3]  }
  0x34   :  { %s887_s27 = smov [#allocation7]   ;;  %s888_s29 = smov [#allocation10]  }
  0x35   :  { %s47_s28 = sshll.u32 %s887_s27, 4  ;;  %s75_s30 = sshll.u32 %s888_s29, 4  ;;  %s48_s28 = int_to_ptr.vmem [resolvable:$true] %s47_s28  ;;  %s76_s30 = int_to_ptr.vmem [resolvable:$true] %s75_s30 }
  0x36   :  { %s808_s13 = scalar_lea.hbm %s1075_s3, 1024 }
  0x37   :  { %p809_p10 = scmp.ne.s32.totalorder %s1075_s3, %s808_s13  ;;  %p812_p11 = scmp.lt.u32.totalorder %s808_s13, %s1075_s3 }
  0x39   :  { %p814_p12 = pnand %p812_p11, %p809_p10 }
  0x3b   :  { %817 = shalt.err (!%p814_p12)
}
  0x3c   :  { %s818_s0 = scalar_lea.vmem %s48_s28, 1024  ;;  %p823_p0 = scmp.lt.s32.totalorder %s48_s28, %s48_s28 }
  0x3d   :  { %p819_p13 = scmp.ne.s32.totalorder %s48_s28, %s818_s0  ;;  %p824_p1 = scmp.lt.s32.totalorder %s818_s0, %s818_s0 }
  0x3f   :  { %p825_p2 = por %p824_p1, %p823_p0 }
  0x41   :  { %p826_p3 = pnand %p825_p2, %p819_p13 }
  0x43   :  { %829 = shalt.err (!%p826_p3)
}
  0x44   :  { %53 = dma.hbm_to_vmem [thread:$0]  %s1075_s3, 1024, %s48_s28, [#allocation6], %s883_s19, %s883_s19, %s884_s20  }
  0x45   :  { %s830_s21 = scalar_lea.hbm %s1079_s7, 1024 }
  0x46   :  { %p831_p4 = scmp.ne.s32.totalorder %s1079_s7, %s830_s21  ;;  %p834_p5 = scmp.lt.u32.totalorder %s830_s21, %s1079_s7 }
  0x48   :  { %p836_p6 = pnand %p834_p5, %p831_p4 }
  0x4a   :  { %839 = shalt.err (!%p836_p6)
}
  0x4b   :  { %s840_s24 = scalar_lea.vmem %s76_s30, 1024  ;;  %p845_p8 = scmp.lt.s32.totalorder %s76_s30, %s76_s30 }
  0x4c   :  { %p841_p7 = scmp.ne.s32.totalorder %s76_s30, %s840_s24  ;;  %p846_p9 = scmp.lt.s32.totalorder %s840_s24, %s840_s24 }
  0x4e   :  { %p847_p10 = por %p846_p9, %p845_p8 }
  0x50   :  { %p848_p11 = pnand %p847_p10, %p841_p7 }
  0x52   :  { %851 = shalt.err (!%p848_p11)
}
  0x53   :  { %81 = dma.hbm_to_vmem [thread:$0]  %s1079_s7, 1024, %s76_s30, [#allocation9], %s883_s19, %s883_s19, %s884_s20  }
  0x54   :  { %874 = dma.done.wait [#allocation3], 128  }
  0x55   :  { %875 = vsyncadd [#allocation3], 4294967168 }
  0x56   :  { %876 = dma.done.wait [#allocation6], 1280  }
  0x57   :  { %877 = vsyncadd [#allocation6], 4294966016 }
  0x58   :  { %878 = dma.done.wait [#allocation9], 2048  }
  0x59   :  { %879 = vsyncadd [#allocation9], 4294965248  ;;  %v889_v0 = vmov 0.0   ;;  %vm890_vm0 = vmmov 0   ;;  %v704_v1 = vld [vmem:[#allocation5] sm:$0xff]   ;;  %v705_v2 = vld [vmem:[#allocation5 + $0x8] sm:$0xff]  }
  0x5a   :  { %626 = vmatprep.subr.bf16.mxu0 %v889_v0  ;;  %630 = vmatprep.mubr.msk.bf16.mxu0 %vm890_vm0, %v889_v0  ;;  %v100_v3 = vld [vmem:[#allocation2] sm:$0xff]  ;;  %vm125_vm1 = vcmask 261120   ;;  %v706_v5 = vld [vmem:[#allocation7] sm:$0xff]   ;;  %v708_v7 = vld [vmem:[#allocation7 + $0x10] sm:$0xff]   ;;  %s891_s30 = smov [#allocation11]  }
  0x5b   :  { %634 = vmatprep.subr.bf16.mxu1 %v889_v0  ;;  %650 = vmatprep.mubr.msk.bf16.mxu1 %vm890_vm0, %v889_v0  ;;  %v101_v4 = vpack.c.bf16 %v100_v3, %v100_v3  ;;  %v707_v6 = vld [vmem:[#allocation7 + $0x8] sm:$0xff]   ;;  %v709_v8 = vld [vmem:[#allocation7 + $0x18] sm:$0xff]   ;;  %v710_v9 = vld [vmem:[#allocation7 + $0x20] sm:$0xff]   ;;  %s554_s11 = sshll.u32 %s891_s30, 4  ;;  %s555_s11 = int_to_ptr.vmem [resolvable:$true] %s554_s11 }
  0x5c   :  { %627 = vmatpush3.bf16.msra.mxu0 %v704_v1  ;;  %635 = vmatpush3.bf16.msra.mxu1 %v706_v5  ;;  %v711_v10 = vld [vmem:[#allocation7 + $0x28] sm:$0xff]   ;;  %v712_v11 = vld [vmem:[#allocation7 + $0x30] sm:$0xff]   ;;  %v713_v12 = vld [vmem:[#allocation7 + $0x38] sm:$0xff]   ;;  %s852_s12 = scalar_lea.vmem %s555_s11, 128  ;;  %p857_p13 = scmp.lt.s32.totalorder %s555_s11, %s555_s11 }
  0x5d   :  { %628 = vmatprep.subr.bf16.mxu0 %v889_v0  ;;  %636 = vmatprep.subr.bf16.mxu1 %v889_v0  ;;  %v565_v13 = vld [vmem:[%s1074_s2] ss:$0 sm:$0xff]  ;;  %v714_v32 = vld [vmem:[#allocation8] sm:$0xff]   ;;  %v716_v34 = vld [vmem:[#allocation8 + $0x10] sm:$0xff]   ;;  %p853_p12 = scmp.ne.s32.totalorder %s555_s11, %s852_s12  ;;  %p858_p0 = scmp.lt.s32.totalorder %s852_s12, %s852_s12 }
  0x5e   :  { %v715_v33 = vld [vmem:[#allocation8 + $0x8] sm:$0xff]   ;;  %v717_v35 = vld [vmem:[#allocation8 + $0x18] sm:$0xff]   ;;  %v718_v36 = vld [vmem:[#allocation8 + $0x20] sm:$0xff]  }
  0x5f   :  { %v719_v37 = vld [vmem:[#allocation8 + $0x28] sm:$0xff]   ;;  %v720_v38 = vld [vmem:[#allocation8 + $0x30] sm:$0xff]   ;;  %v721_v39 = vld [vmem:[#allocation8 + $0x38] sm:$0xff]   ;;  %p859_p1 = por %p858_p0, %p857_p13 }
  0x60   :  { %629 = vmatpush3.bf16.msra.mxu0 %v705_v2  ;;  %637 = vmatpush3.bf16.msra.mxu1 %v707_v6  ;;  %v569_v40 = vld [vmem:[%s1076_s4] ss:$0 sm:$0xff]  ;;  %v722_v59 = vld [vmem:[#allocation10] sm:$0xff]   ;;  %v724_v61 = vld [vmem:[#allocation10 + $0x10] sm:$0xff]  }
  0x61   :  { %654 = vmatprep.subr.bf16.mxu0 %v889_v0  ;;  %638 = vmatprep.subr.bf16.mxu1 %v889_v0  ;;  %v723_v60 = vld [vmem:[#allocation10 + $0x8] sm:$0xff]   ;;  %v725_v62 = vld [vmem:[#allocation10 + $0x18] sm:$0xff]   ;;  %v726_v63 = vld [vmem:[#allocation10 + $0x20] sm:$0xff]   ;;  %p860_p2 = pnand %p859_p1, %p853_p12 }
  0x62   :  { %v727_v1 = vld [vmem:[#allocation10 + $0x28] sm:$0xff]   ;;  %v728_v2 = vld [vmem:[#allocation10 + $0x30] sm:$0xff]   ;;  %v729_v3 = vld [vmem:[#allocation10 + $0x38] sm:$0xff]  }
  0x63   :  { %631 = vmatmul.mubr.msk.bf16.vlgmr.msra.gmra.mrb[0].mxu0 %vm125_vm1, %v101_v4  ;;  %v578_v4 = vld [vmem:[%s1078_s6] ss:$0 sm:$0xff] }
  0x64   :  { %670 = vmatprep.mubr.msk.bf16.mxu0 %vm890_vm0, %v889_v0  ;;  %639 = vmatpush3.bf16.msra.mxu1 %v708_v7 }
  0x65   :  { %640 = vmatprep.subr.bf16.mxu1 %v889_v0  ;;  %655 = vmatpush3.bf16.msra.mxu0 %v714_v32 }
  0x66   :  { %656 = vmatprep.subr.bf16.mxu0 %v889_v0 }
  0x68   :  { %641 = vmatpush3.bf16.msra.mxu1 %v709_v8 }
  0x69   :  { %642 = vmatprep.subr.bf16.mxu1 %v889_v0  ;;  %657 = vmatpush3.bf16.msra.mxu0 %v715_v33 }
  0x6a   :  { %658 = vmatprep.subr.bf16.mxu0 %v889_v0 }
  0x6c   :  { %643 = vmatpush3.bf16.msra.mxu1 %v710_v9 }
  0x6d   :  { %644 = vmatprep.subr.bf16.mxu1 %v889_v0  ;;  %659 = vmatpush3.bf16.msra.mxu0 %v716_v34 }
  0x6e   :  { %660 = vmatprep.subr.bf16.mxu0 %v889_v0 }
  0x70   :  { %645 = vmatpush3.bf16.msra.mxu1 %v711_v10 }
  0x71   :  { %646 = vmatprep.subr.bf16.mxu1 %v889_v0  ;;  %661 = vmatpush3.bf16.msra.mxu0 %v717_v35 }
  0x72   :  { %662 = vmatprep.subr.bf16.mxu0 %v889_v0 }
  0x74   :  { %647 = vmatpush3.bf16.msra.mxu1 %v712_v11 }
  0x75   :  { %648 = vmatprep.subr.bf16.mxu1 %v889_v0  ;;  %663 = vmatpush3.bf16.msra.mxu0 %v718_v36 }
  0x76   :  { %664 = vmatprep.subr.bf16.mxu0 %v889_v0 }
  0x78   :  { %649 = vmatpush3.bf16.msra.mxu1 %v713_v12 }
  0x79   :  { %674 = vmatprep.subr.bf16.mxu1 %v889_v0  ;;  %665 = vmatpush3.bf16.msra.mxu0 %v719_v37 }
  0x7a   :  { %666 = vmatprep.subr.bf16.mxu0 %v889_v0 }
  0x7d   :  { %667 = vmatpush3.bf16.msra.mxu0 %v720_v38 }
  0x7e   :  { %668 = vmatprep.subr.bf16.mxu0 %v889_v0 }
  0x81   :  { %669 = vmatpush3.bf16.msra.mxu0 %v721_v39 }
 0x136   :  { %v163_v14 = vpop.f32.mrb[0].mxu0 }
 0x137   :  { %v164_v15 = vadd.f32 %v565_v13, %v163_v14  ;;  %v632_v16 = vpop.f32.mrb[1].mxu0 }
 0x138   :  { %v166_v17 = vpop.f32.mrb[2].mxu0 }
 0x139   :  { %v169_v18 = vmin.f32 %v164_v15, 20.0  ;;  %v633_v19 = vpop.f32.mrb[3].mxu0  ;;  %vm170_vm3 = vcmp.gt.f32.partialorder %v164_v15, 20.0 }
 0x13b   :  { %v171_v20 = vmul.f32 1.442695, %v169_v18 }
 0x13d   :  { %730 = vpow2.f32 %v171_v20 }
 0x147   :  { %v731_v21 = vpop.eup %730 }
 0x148   :  { %v173_v22 = vadd.f32 1.0, %v731_v21  ;;  %v176_v23 = vmul.f32 -0.5, %v731_v21  ;;  %v179_v25 = vand.u32 2147483647, %v731_v21 }
 0x14a   :  { %732 = vlog2.f32 %v173_v22  ;;  %v177_v24 = vadd.f32 1.0, %v176_v23  ;;  %vm180_vm2 = vcmp.lt.f32.partialorder %v179_v25, 0.0004427343  ;;  %v587_v22 = vld [vmem:[%s1080_s8] ss:$0 sm:$0xff] }
 0x14c   :  { %v178_v28 = vmul.f32 %v731_v21, %v177_v24 }
 0x154   :  { %v733_v26 = vpop.eup %732 }
 0x155   :  { %v175_v27 = vmul.f32 0.6931472, %v733_v26 }
 0x157   :  { %v181_v29 = vsel %vm180_vm2, %v178_v28, %v175_v27 }
 0x158   :  { %v182_v30 = vsel %vm170_vm3, %v164_v15, %v181_v29 }
 0x159   :  { %v183_v31 = vpack.c.bf16 %v182_v30, %v182_v30 }
 0x15b   :  { %651 = vmatmul.mubr.bf16.vlgmr.msra.gmra.mrb[0].mxu1 %v183_v31 }
 0x15c   :  { %690 = vmatprep.mubr.msk.bf16.mxu1 %vm890_vm0, %v889_v0  ;;  %675 = vmatpush3.bf16.msra.mxu1 %v722_v59 }
 0x15d   :  { %676 = vmatprep.subr.bf16.mxu1 %v889_v0 }
 0x160   :  { %677 = vmatpush3.bf16.msra.mxu1 %v723_v60 }
 0x161   :  { %678 = vmatprep.subr.bf16.mxu1 %v889_v0 }
 0x164   :  { %679 = vmatpush3.bf16.msra.mxu1 %v724_v61 }
 0x165   :  { %680 = vmatprep.subr.bf16.mxu1 %v889_v0 }
 0x168   :  { %681 = vmatpush3.bf16.msra.mxu1 %v725_v62 }
 0x169   :  { %682 = vmatprep.subr.bf16.mxu1 %v889_v0 }
 0x16c   :  { %683 = vmatpush3.bf16.msra.mxu1 %v726_v63 }
 0x16d   :  { %684 = vmatprep.subr.bf16.mxu1 %v889_v0 }
 0x170   :  { %685 = vmatpush3.bf16.msra.mxu1 %v727_v1 }
 0x171   :  { %686 = vmatprep.subr.bf16.mxu1 %v889_v0 }
 0x174   :  { %687 = vmatpush3.bf16.msra.mxu1 %v728_v2 }
 0x175   :  { %688 = vmatprep.subr.bf16.mxu1 %v889_v0 }
 0x178   :  { %689 = vmatpush3.bf16.msra.mxu1 %v729_v3 }
 0x22e   :  { %v289_v41 = vpop.f32.mrb[0].mxu1 }
 0x22f   :  { %v290_v42 = vadd.f32 %v569_v40, %v289_v41  ;;  %v652_v43 = vpop.f32.mrb[1].mxu1 }
 0x230   :  { %v292_v44 = vpop.f32.mrb[2].mxu1 }
 0x231   :  { %v295_v45 = vmin.f32 %v290_v42, 20.0  ;;  %v653_v46 = vpop.f32.mrb[3].mxu1  ;;  %vm296_vm5 = vcmp.gt.f32.partialorder %v290_v42, 20.0 }
 0x233   :  { %v297_v47 = vmul.f32 1.442695, %v295_v45 }
 0x235   :  { %734 = vpow2.f32 %v297_v47 }
 0x23f   :  { %v735_v48 = vpop.eup %734 }
 0x240   :  { %v299_v49 = vadd.f32 1.0, %v735_v48  ;;  %v302_v50 = vmul.f32 -0.5, %v735_v48  ;;  %v305_v52 = vand.u32 2147483647, %v735_v48 }
 0x242   :  { %736 = vlog2.f32 %v299_v49  ;;  %v303_v51 = vadd.f32 1.0, %v302_v50  ;;  %vm306_vm4 = vcmp.lt.f32.partialorder %v305_v52, 0.0004427343 }
 0x244   :  { %v304_v55 = vmul.f32 %v735_v48, %v303_v51 }
 0x24c   :  { %v737_v53 = vpop.eup %736 }
 0x24d   :  { %v301_v54 = vmul.f32 0.6931472, %v737_v53 }
 0x24f   :  { %v307_v56 = vsel %vm306_vm4, %v304_v55, %v301_v54 }
 0x250   :  { %v308_v57 = vsel %vm296_vm5, %v290_v42, %v307_v56 }
 0x251   :  { %v309_v58 = vpack.c.bf16 %v308_v57, %v308_v57 }
 0x253   :  { %671 = vmatmul.mubr.bf16.vlgmr.msra.gmra.mrb[4].mxu0 %v309_v58 }
 0x326   :  { %v415_v5 = vpop.f32.mrb[4].mxu0 }
 0x327   :  { %v416_v6 = vadd.f32 %v578_v4, %v415_v5  ;;  %v672_v7 = vpop.f32.mrb[5].mxu0 }
 0x328   :  { %v418_v8 = vpop.f32.mrb[6].mxu0 }
 0x329   :  { %v421_v9 = vmin.f32 %v416_v6, 20.0  ;;  %v673_v10 = vpop.f32.mrb[7].mxu0  ;;  %vm422_vm7 = vcmp.gt.f32.partialorder %v416_v6, 20.0 }
 0x32b   :  { %v423_v11 = vmul.f32 1.442695, %v421_v9 }
 0x32d   :  { %738 = vpow2.f32 %v423_v11 }
 0x337   :  { %v739_v12 = vpop.eup %738 }
 0x338   :  { %v425_v13 = vadd.f32 1.0, %v739_v12  ;;  %v428_v14 = vmul.f32 -0.5, %v739_v12  ;;  %v431_v0 = vand.u32 2147483647, %v739_v12 }
 0x33a   :  { %740 = vlog2.f32 %v425_v13  ;;  %v429_v15 = vadd.f32 1.0, %v428_v14  ;;  %vm432_vm6 = vcmp.lt.f32.partialorder %v431_v0, 0.0004427343 }
 0x33c   :  { %v430_v18 = vmul.f32 %v739_v12, %v429_v15 }
 0x344   :  { %v741_v16 = vpop.eup %740 }
 0x345   :  { %v427_v17 = vmul.f32 0.6931472, %v741_v16 }
 0x347   :  { %v433_v19 = vsel %vm432_vm6, %v430_v18, %v427_v17 }
 0x348   :  { %v434_v20 = vsel %vm422_vm7, %v416_v6, %v433_v19 }
 0x349   :  { %v435_v21 = vpack.c.bf16 %v434_v20, %v434_v20 }
 0x34b   :  { %691 = vmatmul.mubr.bf16.vlgmr.msra.gmra.mrb[4].mxu1 %v435_v21 }
 0x41e   :  { %v541_v23 = vpop.f32.mrb[4].mxu1 }
 0x41f   :  { %v542_v24 = vadd.f32 %v587_v22, %v541_v23  ;;  %v692_v25 = vpop.f32.mrb[5].mxu1 }
 0x420   :  { %v544_v26 = vpop.f32.mrb[6].mxu1 }
 0x421   :  { %547 = vst [vmem:[#allocation11] sm:$0xff] %v542_v24  ;;  %v693_v27 = vpop.f32.mrb[7].mxu1 }
 0x422   :  { %863 = shalt.err (!%p860_p2)
}
 0x423   :  { %s864_s8 = scalar_lea.hbm %s1081_s9, 128 }
 0x424   :  { %p865_p3 = scmp.ne.s32.totalorder %s1081_s9, %s864_s8  ;;  %p868_p4 = scmp.lt.u32.totalorder %s864_s8, %s1081_s9 }
 0x426   :  { %p870_p5 = pnand %p868_p4, %p865_p3 }
 0x428   :  { %873 = shalt.err (!%p870_p5)
}
 0x429   :  { %557 = dma.vmem_to_hbm [thread:$0]  %s555_s11, 128, %s1081_s9, [#allocation4]  }
 0x42a   :  { %880 = dma.done.wait [#allocation4], 128  }
 0x42b   :  { %881 = vsyncadd [#allocation4], 4294967168 }
 0x42c   :  { %561 = vsyncpa [#allocation3], 1 }
 0x42d   :  { %562 = vsyncpa [#allocation6], 1 }
 0x42e   :  { %563 = vsyncpa [#allocation9], 1 }
 0x42f   :  { %564 = vsyncpa [#allocation4], 1 }

</bundles_post_ra>
